<compile_context>
chip_gen: v7x
topology: tpu7x:2x2x1
jax: 0.10.0
libtpu: 0.0.40
codegen_flags: <defaults>
</compile_context>

<pallas_src>
import jax
import jax.numpy as jnp
import numpy as np
from jax import lax
from jax.experimental import pallas as pl
from jax.experimental.pallas import tpu as pltpu

H = 32      # hidden_size
O = 16      # output_size (vocab)
L = 8       # max_length (encoder sequence length)
LANE = 128
WROWS = 7 * H   # rows in the packed weight slab (attn 2H + Wih 2H + Whh H + out 2H)


def decoder_kernel(emb_ref, h0_ref, enc_ref, w_ref, b_ref, out_ref, h_scr):
    t = pl.program_id(0)

    @pl.when(t == 0)
    def _init():
        h_scr[...] = h0_ref[...]

    emb = emb_ref[0]            # (1, H)   dropout(embedding(word_input)) — identity dropout
    h_prev = h_scr[...]         # (1, H)   hidden carried in VMEM across steps
    enc = enc_ref[...]          # (L, H)   encoder_outputs (VMEM-resident)

    # ---- Attn('concat'): score_t = v . tanh(W_a [h ; enc_t] + b_a) ----------
    # weight-slab cols >= H are zero, so the 128-lane padding flows through as 0.
    h_proj = jnp.dot(h_prev, w_ref[0:H, :], preferred_element_type=jnp.float32)     # (1,128)
    e_proj = jnp.dot(enc, w_ref[H:2 * H, :], preferred_element_type=jnp.float32)    # (L,128)
    energy = jnp.tanh(e_proj + h_proj + b_ref[0:1, :])                               # (L,128)
    v_row = b_ref[1:2, :]                                                            # (1,128)
    # scores = v @ energy^T  (MXU, contract lane dims)
    scores = lax.dot_general(v_row, energy, (((1,), (1,)), ((), ())),
                             preferred_element_type=jnp.float32)                     # (1, L)
    m = jnp.max(scores, axis=1, keepdims=True)
    e = jnp.exp(scores - m)
    attn_w = e / jnp.sum(e, axis=1, keepdims=True)                                   # (1, L)

    # context = attn_weights @ encoder_outputs  (MXU)
    context = jnp.dot(attn_w, enc, preferred_element_type=jnp.float32)               # (1, H)

    # ---- GRU cell (seq_len=1, n_layers=1); x = [emb ; context]; gates r,z,n --
    x = jnp.concatenate([emb, context], axis=1)                                      # (1, 2H)
    gi = jnp.dot(x, w_ref[2 * H:4 * H, :],
                 preferred_element_type=jnp.float32) + b_ref[2:3, :]                 # (1,128)
    gh = jnp.dot(h_prev, w_ref[4 * H:5 * H, :],
                 preferred_element_type=jnp.float32) + b_ref[3:4, :]                 # (1,128)
    r = jax.nn.sigmoid(gi[:, 0:H] + gh[:, 0:H])
    z = jax.nn.sigmoid(gi[:, H:2 * H] + gh[:, H:2 * H])
    n = jnp.tanh(gi[:, 2 * H:3 * H] + r * gh[:, 2 * H:3 * H])
    h_new = (1.0 - z) * n + z * h_prev                                               # (1, H)
    h_scr[...] = h_new

    # ---- output = log_softmax(Linear([gru_out ; context])) ------------------
    feat = jnp.concatenate([h_new, context], axis=1)                                 # (1, 2H)
    logits = (jnp.dot(feat, w_ref[5 * H:7 * H, :],
                      preferred_element_type=jnp.float32) + b_ref[4:5, :])[:, 0:O]   # (1, O)
    lmax = jnp.max(logits, axis=1, keepdims=True)
    shifted = logits - lmax
    logp = shifted - jnp.log(jnp.sum(jnp.exp(shifted), axis=1, keepdims=True))       # (1, O)

    # ---- single lane-dense packed output row: [logp | h_new | attn | 0-pad] --
    pad = jnp.zeros((1, LANE - O - H - L), jnp.float32)
    out_ref[0] = jnp.concatenate([logp, h_new, attn_w, pad], axis=1)                 # (1,128)


def pack_params(params):
    """Pack all weights/biases into two lane-padded slabs (one DMA each)."""
    Wih = jnp.transpose(params["gru_Wih"], (1, 0, 2)).reshape(2 * H, 3 * H)   # lanes: r|z|n
    Whh = jnp.transpose(params["gru_Whh"], (1, 0, 2)).reshape(H, 3 * H)
    bih = jnp.transpose(params["gru_bih"], (1, 0, 2)).reshape(1, 3 * H)
    bhh = jnp.transpose(params["gru_bhh"], (1, 0, 2)).reshape(1, 3 * H)

    wslab = jnp.zeros((WROWS, LANE), jnp.float32)
    wslab = wslab.at[0:2 * H, 0:H].set(params["attn_W"])        # rows   0: 64  attn (h | enc)
    wslab = wslab.at[2 * H:4 * H, 0:3 * H].set(Wih)             # rows  64:128  GRU W_ih (2H,3H)
    wslab = wslab.at[4 * H:5 * H, 0:3 * H].set(Whh)             # rows 128:160  GRU W_hh (H,3H)
    wslab = wslab.at[5 * H:7 * H, 0:O].set(params["out_W"])     # rows 160:224  out (2H,O)

    bslab = jnp.zeros((8, LANE), jnp.float32)
    bslab = bslab.at[0:1, 0:H].set(params["attn_b"])
    bslab = bslab.at[1:2, 0:H].set(params["attn_v"])
    bslab = bslab.at[2:3, 0:3 * H].set(bih)
    bslab = bslab.at[3:4, 0:3 * H].set(bhh)
    bslab = bslab.at[4:5, 0:O].set(params["out_b"])
    return wslab, bslab


@jax.jit
def bahdanau_decode(word_inputs, last_hidden, encoder_outputs, params):
    """Run T teacher-forced decoder steps in ONE pallas_call (weights resident).

    word_inputs: (T,) int32; last_hidden: (1,1,H); encoder_outputs: (L,1,H).
    Returns (logp (T,O), hidden (1,1,H), attn_weights (T,1,L)).
    """
    T = word_inputs.shape[0]
    emb = params["embedding"][word_inputs].reshape(T, 1, H)   # embedding + eval dropout
    h0 = last_hidden[-1]                                      # (1, H)
    enc = encoder_outputs[:, 0, :]                            # (L, H)
    wslab, bslab = pack_params(params)                        # pre-packable in a real loop

    packed = pl.pallas_call(
        decoder_kernel,
        out_shape=jax.ShapeDtypeStruct((T, 1, LANE), jnp.float32),
        grid=(T,),
        in_specs=[
            pl.BlockSpec((1, 1, H), lambda t: (t, 0, 0)),       # per-step embedded input
            pl.BlockSpec((1, H), lambda t: (0, 0)),             # h0 (DMA'd once)
            pl.BlockSpec((L, H), lambda t: (0, 0)),             # encoder outputs (resident)
            pl.BlockSpec((WROWS, LANE), lambda t: (0, 0)),      # packed weights (resident)
            pl.BlockSpec((8, LANE), lambda t: (0, 0)),          # packed biases (resident)
        ],
        out_specs=pl.BlockSpec((1, 1, LANE), lambda t: (t, 0, 0)),
        scratch_shapes=[pltpu.VMEM((1, H), jnp.float32)],       # carried hidden state
        compiler_params=pltpu.CompilerParams(
            dimension_semantics=("arbitrary",)),                # steps are sequential
    )(emb, h0, enc, wslab, bslab)

    packed = packed.reshape(T, LANE)
    logp = packed[:, 0:O]                                      # (T, O)
    hidden = packed[T - 1, O:O + H].reshape(1, 1, H)           # final hidden
    attn_weights = packed[:, O + H:O + H + L].reshape(T, 1, L)
    return logp, hidden, attn_weights


def bahdanau_decoder_step(word_input, last_hidden, encoder_outputs, params):
    """Exact single-step forward of the PyTorch module (T == 1)."""
    wi = jnp.reshape(word_input, (1,)).astype(jnp.int32)
    logp, hidden, attn_weights = bahdanau_decode(wi, last_hidden, encoder_outputs, params)
    return logp, hidden, attn_weights       # (1,O), (1,1,H), (1,1,L)


# ----------------------------- pure-JAX reference -----------------------------
def reference_step(word_input, last_hidden, encoder_outputs, params):
    emb = params["embedding"][word_input].reshape(1, H)
    h_prev = last_hidden[-1]                          # (1, H)
    enc = encoder_outputs[:, 0, :]                    # (L, H)

    cat_he = jnp.concatenate([jnp.broadcast_to(h_prev, (L, H)), enc], axis=1)
    energy = jnp.tanh(cat_he @ params["attn_W"] + params["attn_b"])
    scores = jnp.sum(energy * params["attn_v"], axis=1)            # (L,)
    w = jax.nn.softmax(scores)                                     # (L,)
    context = (w[None, :] @ enc)                                   # (1, H)

    x = jnp.concatenate([emb, context], axis=1)                    # (1, 2H)
    gi = jnp.einsum("bi,gio->gbo", x, params["gru_Wih"]) + params["gru_bih"]
    gh = jnp.einsum("bi,gio->gbo", h_prev, params["gru_Whh"]) + params["gru_bhh"]
    r = jax.nn.sigmoid(gi[0] + gh[0])
    z = jax.nn.sigmoid(gi[1] + gh[1])
    n = jnp.tanh(gi[2] + r * gh[2])
    h_new = (1.0 - z) * n + z * h_prev

    feat = jnp.concatenate([h_new, context], axis=1)
    logits = feat @ params["out_W"] + params["out_b"]
    logp = jax.nn.log_softmax(logits, axis=-1)
    return logp, h_new[None], w.reshape(1, 1, L)


def reference_decode(word_inputs, last_hidden, encoder_outputs, params):
    logps, attns = [], []
    h = last_hidden
    for t in range(word_inputs.shape[0]):
        lp, h, aw = reference_step(word_inputs[t], h, encoder_outputs, params)
        logps.append(lp)
        attns.append(aw)
    return jnp.concatenate(logps, axis=0), h, jnp.concatenate(attns, axis=0)


def init_params(key):
    ks = jax.random.split(key, 10)

    def uni(k, shape, fan_in):
        b = 1.0 / np.sqrt(fan_in)
        return jax.random.uniform(k, shape, jnp.float32, -b, b)

    return {
        "embedding": jax.random.normal(ks[0], (O, H), jnp.float32),
        "attn_W":   uni(ks[1], (2 * H, H), 2 * H),       # nn.Linear(2H, H) weight^T
        "attn_b":   uni(ks[2], (1, H), 2 * H),
        "attn_v":   jax.random.uniform(ks[3], (1, H), jnp.float32),  # torch.rand(H)
        "gru_Wih":  uni(ks[4], (3, 2 * H, H), H),        # gates r,z,n ; (in=2H, out=H)
        "gru_Whh":  uni(ks[5], (3, H, H), H),
        "gru_bih":  uni(ks[6], (3, 1, H), H),
        "gru_bhh":  uni(ks[7], (3, 1, H), H),
        "out_W":    uni(ks[8], (2 * H, O), 2 * H),       # nn.Linear(2H, O) weight^T
        "out_b":    uni(ks[9], (1, O), 2 * H),
    }


if __name__ == "__main__":
    key = jax.random.PRNGKey(0)
    kp, kh, ke = jax.random.split(key, 3)

    params = init_params(kp)
    last_hidden = jax.random.normal(kh, (1, 1, H), jnp.float32)       # (n_layers, B, H)
    encoder_outputs = jax.random.normal(ke, (L, 1, H), jnp.float32)   # (L, B, H)

    # --- single step: exact module forward semantics ---
    word_input = jnp.array(3, dtype=jnp.int32)
    logp, hidden, attn_w = jax.block_until_ready(
        bahdanau_decoder_step(word_input, last_hidden, encoder_outputs, params))
    ref_logp, ref_hidden, ref_attn = jax.block_until_ready(
        reference_step(word_input, last_hidden, encoder_outputs, params))

    np.testing.assert_allclose(np.asarray(logp), np.asarray(ref_logp), rtol=2e-3, atol=2e-3)
    np.testing.assert_allclose(np.asarray(hidden), np.asarray(ref_hidden), rtol=2e-3, atol=2e-3)
    np.testing.assert_allclose(np.asarray(attn_w), np.asarray(ref_attn), rtol=2e-3, atol=2e-3)

    # --- fused multi-step decode (weights resident across steps) ---
    word_inputs = jnp.array([3, 1, 7, 2], dtype=jnp.int32)
    m_logp, m_hidden, m_attn = jax.block_until_ready(
        bahdanau_decode(word_inputs, last_hidden, encoder_outputs, params))
    r_logp, r_hidden, r_attn = jax.block_until_ready(
        reference_decode(word_inputs, last_hidden, encoder_outputs, params))

    np.testing.assert_allclose(np.asarray(m_logp), np.asarray(r_logp), rtol=2e-3, atol=2e-3)
    np.testing.assert_allclose(np.asarray(m_hidden), np.asarray(r_hidden), rtol=2e-3, atol=2e-3)
    np.testing.assert_allclose(np.asarray(m_attn), np.asarray(r_attn), rtol=2e-3, atol=2e-3)

    print("KERNEL_OK")
</pallas_src>

<mosaic_0001>
module attributes {stable_mosaic.version = 11 : i64} {
  func.func @decoder_kernel(%arg0: i32, %arg1: memref<1x1x32xf32, #tpu.memory_space<vmem>>, %arg2: memref<1x32xf32, #tpu.memory_space<vmem>>, %arg3: memref<8x32xf32, #tpu.memory_space<vmem>>, %arg4: memref<224x128xf32, #tpu.memory_space<vmem>>, %arg5: memref<8x128xf32, #tpu.memory_space<vmem>>, %arg6: memref<1x1x128xf32, #tpu.memory_space<vmem>>, %arg7: memref<1x32xf32, #tpu.memory_space<vmem>>) attributes {dimension_semantics = [#tpu.dimension_semantics<arbitrary>], iteration_bounds = array<i64: 1>, scalar_prefetch = 0 : i64, scratch_operands = 1 : i64, tpu.core_type = #tpu.core_type<tc>, window_params = [{transform_indices = @transform_0, window_bounds = array<i64: 1, 1, 32>}, {pipeline_mode = #tpu.pipeline_mode<synchronous>, transform_indices = @transform_1, window_bounds = array<i64: 1, 32>}, {pipeline_mode = #tpu.pipeline_mode<synchronous>, transform_indices = @transform_2, window_bounds = array<i64: 8, 32>}, {pipeline_mode = #tpu.pipeline_mode<synchronous>, transform_indices = @transform_3, window_bounds = array<i64: 224, 128>}, {pipeline_mode = #tpu.pipeline_mode<synchronous>, transform_indices = @transform_4, window_bounds = array<i64: 8, 128>}, {transform_indices = @transform_5, window_bounds = array<i64: 1, 1, 128>}]} {
    %c0_i32 = arith.constant 0 : i32
    %0 = arith.cmpi eq, %arg0, %c0_i32 : i32
    %1 = arith.extui %0 : i1 to i32
    %c0_i32_0 = arith.constant 0 : i32
    %2 = arith.cmpi ne, %1, %c0_i32_0 : i32
    scf.if %2 {
      %c0_38 = arith.constant 0 : index
      %c0_39 = arith.constant 0 : index
      %86 = vector.load %arg2[%c0_38, %c0_39] : memref<1x32xf32, #tpu.memory_space<vmem>>, vector<1x32xf32>
      %c0_40 = arith.constant 0 : index
      %c0_41 = arith.constant 0 : index
      %87 = vector.load %arg7[%c0_40, %c0_41] : memref<1x32xf32, #tpu.memory_space<vmem>>, vector<1x32xf32>
      tpu.vector_store %arg7[%c0_40, %c0_41], %86 {strides = array<i32>} : memref<1x32xf32, #tpu.memory_space<vmem>>, vector<1x32xf32>,
    } else {
    }
    %c0 = arith.constant 0 : index
    %c0_1 = arith.constant 0 : index
    %c0_2 = arith.constant 0 : index
    %3 = vector.load %arg1[%c0, %c0_1, %c0_2] : memref<1x1x32xf32, #tpu.memory_space<vmem>>, vector<1x1x32xf32>
    %4 = vector.shape_cast %3 : vector<1x1x32xf32> to vector<1x32xf32>
    %c0_3 = arith.constant 0 : index
    %c0_4 = arith.constant 0 : index
    %5 = vector.load %arg7[%c0_3, %c0_4] : memref<1x32xf32, #tpu.memory_space<vmem>>, vector<1x32xf32>
    %c0_5 = arith.constant 0 : index
    %c0_6 = arith.constant 0 : index
    %6 = vector.load %arg3[%c0_5, %c0_6] : memref<8x32xf32, #tpu.memory_space<vmem>>, vector<8x32xf32>
    %c0_7 = arith.constant 0 : index
    %c0_8 = arith.constant 0 : index
    %7 = vector.load %arg4[%c0_7, %c0_8] : memref<224x128xf32, #tpu.memory_space<vmem>>, vector<32x128xf32>
    %cst = arith.constant dense<0.000000e+00> : vector<1x128xf32>
    %8 = tpu.matmul %5, %7, %cst {dimension_numbers = #tpu.dot_dimension_numbers<[1], [0], [0], [1], [0, 0, 1, 1], [], []>} : vector<1x32xf32>, vector<32x128xf32>, vector<1x128xf32> -> vector<1x128xf32>
    %c32 = arith.constant 32 : index
    %c0_9 = arith.constant 0 : index
    %9 = vector.load %arg4[%c32, %c0_9] : memref<224x128xf32, #tpu.memory_space<vmem>>, vector<32x128xf32>
    %cst_10 = arith.constant dense<0.000000e+00> : vector<8x128xf32>
    %10 = tpu.matmul %6, %9, %cst_10 {dimension_numbers = #tpu.dot_dimension_numbers<[1], [0], [0], [1], [0, 0, 1, 1], [], []>} : vector<8x32xf32>, vector<32x128xf32>, vector<8x128xf32> -> vector<8x128xf32>
    %11 = vector.broadcast %8 : vector<1x128xf32> to vector<8x128xf32>
    %12 = arith.addf %10, %11 : vector<8x128xf32>
    %c0_11 = arith.constant 0 : index
    %c0_12 = arith.constant 0 : index
    %13 = vector.load %arg5[%c0_11, %c0_12] : memref<8x128xf32, #tpu.memory_space<vmem>>, vector<1x128xf32>
    %14 = vector.broadcast %13 : vector<1x128xf32> to vector<8x128xf32>
    %15 = arith.addf %12, %14 : vector<8x128xf32>
    %16 = math.tanh %15 : vector<8x128xf32>
    %c1 = arith.constant 1 : index
    %c0_13 = arith.constant 0 : index
    %17 = vector.load %arg5[%c1, %c0_13] : memref<8x128xf32, #tpu.memory_space<vmem>>, vector<1x128xf32>
    %cst_14 = arith.constant dense<0.000000e+00> : vector<1x8xf32>
    %18 = tpu.matmul %17, %16, %cst_14 {dimension_numbers = #tpu.dot_dimension_numbers<[1], [1], [0], [0], [0, 0, 1, 0], [], []>} : vector<1x128xf32>, vector<8x128xf32>, vector<1x8xf32> -> vector<1x8xf32>
    %cst_15 = arith.constant dense<0xFF800000> : vector<1xf32>
    %19 = vector.multi_reduction <maximumf>, %18, %cst_15 [1] : vector<1x8xf32> to vector<1xf32>
    %20 = vector.shape_cast %19 : vector<1xf32> to vector<1x1xf32>
    %21 = vector.broadcast %20 : vector<1x1xf32> to vector<1x8xf32>
    %22 = arith.subf %18, %21 : vector<1x8xf32>
    %23 = math.exp %22 : vector<1x8xf32>
    %cst_16 = arith.constant dense<0.000000e+00> : vector<1xf32>
    %24 = vector.multi_reduction <add>, %23, %cst_16 [1] : vector<1x8xf32> to vector<1xf32>
    %25 = vector.shape_cast %24 : vector<1xf32> to vector<1x1xf32>
    %26 = vector.broadcast %25 : vector<1x1xf32> to vector<1x8xf32>
    %27 = arith.divf %23, %26 : vector<1x8xf32>
    %cst_17 = arith.constant dense<0.000000e+00> : vector<1x32xf32>
    %28 = tpu.matmul %27, %6, %cst_17 {dimension_numbers = #tpu.dot_dimension_numbers<[1], [0], [0], [1], [0, 0, 1, 1], [], []>} : vector<1x8xf32>, vector<8x32xf32>, vector<1x32xf32> -> vector<1x32xf32>
    %29 = tpu.concatenate %4, %28 in 1 : vector<1x32xf32>, vector<1x32xf32> -> vector<1x64xf32>
    %c64 = arith.constant 64 : index
    %c0_18 = arith.constant 0 : index
    %30 = vector.load %arg4[%c64, %c0_18] : memref<224x128xf32, #tpu.memory_space<vmem>>, vector<64x128xf32>
    %cst_19 = arith.constant dense<0.000000e+00> : vector<1x128xf32>
    %31 = tpu.matmul %29, %30, %cst_19 {dimension_numbers = #tpu.dot_dimension_numbers<[1], [0], [0], [1], [0, 0, 1, 1], [], []>} : vector<1x64xf32>, vector<64x128xf32>, vector<1x128xf32> -> vector<1x128xf32>
    %c2 = arith.constant 2 : index
    %c0_20 = arith.constant 0 : index
    %32 = vector.load %arg5[%c2, %c0_20] : memref<8x128xf32, #tpu.memory_space<vmem>>, vector<1x128xf32>
    %33 = arith.addf %31, %32 : vector<1x128xf32>
    %c128 = arith.constant 128 : index
    %c0_21 = arith.constant 0 : index
    %34 = vector.load %arg4[%c128, %c0_21] : memref<224x128xf32, #tpu.memory_space<vmem>>, vector<32x128xf32>
    %cst_22 = arith.constant dense<0.000000e+00> : vector<1x128xf32>
    %35 = tpu.matmul %5, %34, %cst_22 {dimension_numbers = #tpu.dot_dimension_numbers<[1], [0], [0], [1], [0, 0, 1, 1], [], []>} : vector<1x32xf32>, vector<32x128xf32>, vector<1x128xf32> -> vector<1x128xf32>
    %c3 = arith.constant 3 : index
    %c0_23 = arith.constant 0 : index
    %36 = vector.load %arg5[%c3, %c0_23] : memref<8x128xf32, #tpu.memory_space<vmem>>, vector<1x128xf32>
    %37 = arith.addf %35, %36 : vector<1x128xf32>
    %38 = vector.extract_strided_slice %33 {offsets = [0, 0], sizes = [1, 32], strides = [1, 1]} : vector<1x128xf32> to vector<1x32xf32>
    %39 = vector.extract_strided_slice %37 {offsets = [0, 0], sizes = [1, 32], strides = [1, 1]} : vector<1x128xf32> to vector<1x32xf32>
    %40 = arith.addf %38, %39 : vector<1x32xf32>
    %41 = arith.negf %40 : vector<1x32xf32>
    %42 = math.exp %41 : vector<1x32xf32>
    %cst_24 = arith.constant 1.000000e+00 : f32
    %43 = vector.broadcast %cst_24 : f32 to vector<1x32xf32>
    %44 = arith.addf %43, %42 : vector<1x32xf32>
    %45 = arith.divf %43, %44 : vector<1x32xf32>
    %46 = vector.extract_strided_slice %33 {offsets = [0, 32], sizes = [1, 32], strides = [1, 1]} : vector<1x128xf32> to vector<1x32xf32>
    %47 = vector.extract_strided_slice %37 {offsets = [0, 32], sizes = [1, 32], strides = [1, 1]} : vector<1x128xf32> to vector<1x32xf32>
    %48 = arith.addf %46, %47 : vector<1x32xf32>
    %49 = arith.negf %48 : vector<1x32xf32>
    %50 = math.exp %49 : vector<1x32xf32>
    %cst_25 = arith.constant 1.000000e+00 : f32
    %51 = vector.broadcast %cst_25 : f32 to vector<1x32xf32>
    %52 = arith.addf %51, %50 : vector<1x32xf32>
    %53 = arith.divf %51, %52 : vector<1x32xf32>
    %54 = vector.extract_strided_slice %33 {offsets = [0, 64], sizes = [1, 32], strides = [1, 1]} : vector<1x128xf32> to vector<1x32xf32>
    %55 = vector.extract_strided_slice %37 {offsets = [0, 64], sizes = [1, 32], strides = [1, 1]} : vector<1x128xf32> to vector<1x32xf32>
    %56 = arith.mulf %45, %55 : vector<1x32xf32>
    %57 = arith.addf %54, %56 : vector<1x32xf32>
    %58 = math.tanh %57 : vector<1x32xf32>
    %cst_26 = arith.constant 1.000000e+00 : f32
    %59 = vector.broadcast %cst_26 : f32 to vector<1x32xf32>
    %60 = arith.subf %59, %53 : vector<1x32xf32>
    %61 = arith.mulf %60, %58 : vector<1x32xf32>
    %62 = arith.mulf %53, %5 : vector<1x32xf32>
    %63 = arith.addf %61, %62 : vector<1x32xf32>
    %c0_27 = arith.constant 0 : index
    %c0_28 = arith.constant 0 : index
    %64 = vector.load %arg7[%c0_27, %c0_28] : memref<1x32xf32, #tpu.memory_space<vmem>>, vector<1x32xf32>
    tpu.vector_store %arg7[%c0_27, %c0_28], %63 {strides = array<i32>} : memref<1x32xf32, #tpu.memory_space<vmem>>, vector<1x32xf32>,
    %65 = tpu.concatenate %63, %28 in 1 : vector<1x32xf32>, vector<1x32xf32> -> vector<1x64xf32>
    %c160 = arith.constant 160 : index
    %c0_29 = arith.constant 0 : index
    %66 = vector.load %arg4[%c160, %c0_29] : memref<224x128xf32, #tpu.memory_space<vmem>>, vector<64x128xf32>
    %cst_30 = arith.constant dense<0.000000e+00> : vector<1x128xf32>
    %67 = tpu.matmul %65, %66, %cst_30 {dimension_numbers = #tpu.dot_dimension_numbers<[1], [0], [0], [1], [0, 0, 1, 1], [], []>} : vector<1x64xf32>, vector<64x128xf32>, vector<1x128xf32> -> vector<1x128xf32>
    %c4 = arith.constant 4 : index
    %c0_31 = arith.constant 0 : index
    %68 = vector.load %arg5[%c4, %c0_31] : memref<8x128xf32, #tpu.memory_space<vmem>>, vector<1x128xf32>
    %69 = arith.addf %67, %68 : vector<1x128xf32>
    %70 = vector.extract_strided_slice %69 {offsets = [0, 0], sizes = [1, 16], strides = [1, 1]} : vector<1x128xf32> to vector<1x16xf32>
    %cst_32 = arith.constant dense<0xFF800000> : vector<1xf32>
    %71 = vector.multi_reduction <maximumf>, %70, %cst_32 [1] : vector<1x16xf32> to vector<1xf32>
    %72 = vector.shape_cast %71 : vector<1xf32> to vector<1x1xf32>
    %73 = vector.broadcast %72 : vector<1x1xf32> to vector<1x16xf32>
    %74 = arith.subf %70, %73 : vector<1x16xf32>
    %75 = math.exp %74 : vector<1x16xf32>
    %cst_33 = arith.constant dense<0.000000e+00> : vector<1xf32>
    %76 = vector.multi_reduction <add>, %75, %cst_33 [1] : vector<1x16xf32> to vector<1xf32>
    %77 = vector.shape_cast %76 : vector<1xf32> to vector<1x1xf32>
    %78 = math.log %77 : vector<1x1xf32>
    %79 = vector.broadcast %78 : vector<1x1xf32> to vector<1x16xf32>
    %80 = arith.subf %74, %79 : vector<1x16xf32>
    %cst_34 = arith.constant 0.000000e+00 : f32
    %81 = vector.broadcast %cst_34 : f32 to vector<1x72xf32>
    %82 = tpu.concatenate %80, %63, %27, %81 in 1 : vector<1x16xf32>, vector<1x32xf32>, vector<1x8xf32>, vector<1x72xf32> -> vector<1x128xf32>
    %c0_35 = arith.constant 0 : index
    %c0_36 = arith.constant 0 : index
    %c0_37 = arith.constant 0 : index
    %83 = vector.load %arg6[%c0_35, %c0_36, %c0_37] : memref<1x1x128xf32, #tpu.memory_space<vmem>>, vector<1x1x128xf32>
    %84 = vector.shape_cast %83 : vector<1x1x128xf32> to vector<1x128xf32>
    %85 = vector.shape_cast %82 : vector<1x128xf32> to vector<1x1x128xf32>
    tpu.vector_store %arg6[%c0_35, %c0_36, %c0_37], %85 {strides = array<i32>} : memref<1x1x128xf32, #tpu.memory_space<vmem>>, vector<1x1x128xf32>,
    return
  }
  func.func @transform_0(%arg0: i32) -> (i32, i32, i32) {
    %c0_i32 = arith.constant 0 : i32
    %c0_i32_0 = arith.constant 0 : i32
    %c0_i32_1 = arith.constant 0 : i32
    return %arg0, %c0_i32, %c0_i32_0 : i32, i32, i32
  }
  func.func @transform_1(%arg0: i32) -> (i32, i32) {
    %c0_i32 = arith.constant 0 : i32
    %c0_i32_0 = arith.constant 0 : i32
    %c0_i32_1 = arith.constant 0 : i32
    return %c0_i32, %c0_i32_0 : i32, i32
  }
  func.func @transform_2(%arg0: i32) -> (i32, i32) {
    %c0_i32 = arith.constant 0 : i32
    %c0_i32_0 = arith.constant 0 : i32
    %c0_i32_1 = arith.constant 0 : i32
    return %c0_i32, %c0_i32_0 : i32, i32
  }
  func.func @transform_3(%arg0: i32) -> (i32, i32) {
    %c0_i32 = arith.constant 0 : i32
    %c0_i32_0 = arith.constant 0 : i32
    %c0_i32_1 = arith.constant 0 : i32
    return %c0_i32, %c0_i32_0 : i32, i32
  }
  func.func @transform_4(%arg0: i32) -> (i32, i32) {
    %c0_i32 = arith.constant 0 : i32
    %c0_i32_0 = arith.constant 0 : i32
    %c0_i32_1 = arith.constant 0 : i32
    return %c0_i32, %c0_i32_0 : i32, i32
  }
  func.func @transform_5(%arg0: i32) -> (i32, i32, i32) {
    %c0_i32 = arith.constant 0 : i32
    %c0_i32_0 = arith.constant 0 : i32
    %c0_i32_1 = arith.constant 0 : i32
    return %arg0, %c0_i32, %c0_i32_0 : i32, i32, i32
  }
}

</mosaic_0001>

<bundles_post_ra>
// kernel: bahdanau_decode.1
= control target key start
LH: loop header
LB: loop body
LE: loop exit
PB: predicated region body
PF: predicated region fallthrough
CT: control target
= control target key end

     0   :  { %v860_v0 = vmov 0.0|0.0   ;;  %vm25_vm0 = vcmask 253952   ;;  %vm861_vm1 = vmmov 0   ;;  %v862_v8 = vmov 0.0   ;;  %s864_s15 = smov 64   ;;  %s865_s6 = smov 96   ;;  %s1066_s3 = inlined_call_operand.vmem [shape: f32[224,128], index: 3, kind: input, shape index: {}]   ;;  %s1067_s1 = inlined_call_operand.vmem [shape: f32[1,32], index: 1, kind: input, shape index: {}]   ;;  %s1068_s2 = inlined_call_operand.vmem [shape: f32[8,32], index: 2, kind: input, shape index: {}]   ;;  %s1069_s4 = inlined_call_operand.vmem [shape: f32[8,128], index: 4, kind: input, shape index: {}]   ;;  %s1070_s0 = inlined_call_operand.vmem [shape: f32[1,1,32], index: 0, kind: input, shape index: {}]   ;;  %s1071_s5 = inlined_call_operand.vmem [shape: f32[1,1,128], index: 5, kind: output, shape index: {}]  }
   0x1   :  { %794 = vmatprep.subr.bf16.mxu0 %v860_v0  ;;  %v30_v1 = vld [vmem:[%s1066_s3] sm:$0xff]  ;;  %v31_v2 = vld [vmem:[%s1066_s3 + $0x8] sm:$0xff]  ;;  %800 = vmatprep.subr.bf16.mxu1 %v860_v0  ;;  %v32_v6 = vld [vmem:[%s1066_s3 + $0x10] sm:$0xff]  ;;  %vm34_vm2 = vcmask 261120   ;;  %v112_v17 = vlaneseq  ;;  %vm267_vm3 = vcmask 57344   ;;  %vm279_vm4 = vcmask 64512  }
   0x2   :  { %v108_v3 = vld [vmem:[%s1066_s3 + $0x20] sm:$0xff]  ;;  %v795_v4 = vpack.c.bf16 %v31_v2, %v30_v1  ;;  %v109_v5 = vld [vmem:[%s1066_s3 + $0x28] sm:$0xff]  ;;  %v33_v7 = vld [vmem:[%s1066_s3 + $0x18] sm:$0xff]  ;;  %721 = vmatprep.mubr.msk.f32.mxu0 %vm861_vm1, %v862_v8  ;;  %732 = vmatprep.mubr.msk.f32.mxu1 %vm861_vm1, %v862_v8  ;;  %vm367_vm5 = vcmask 523264   ;;  %vm638_vm6 = vcmask 122880   ;;  %s866_s12 = smov 112  }
   0x3   :  { %v801_v9 = vpack.c.bf16 %v109_v5, %v108_v3  ;;  %v110_v10 = vld [vmem:[%s1066_s3 + $0x30] sm:$0xff]  ;;  %v111_v11 = vld [vmem:[%s1066_s3 + $0x38] sm:$0xff]  ;;  %v24_v12 = vld [vmem:[%s1067_s1] sm:$0x1]  ;;  %v798_v13 = vpack.c.bf16 %v33_v7, %v32_v6  ;;  %v948_v18 = vshrl.u32 %v112_v17, 7  ;;  %s867_s1 = smov 48  }
   0x4   :  { %796 = vmatpush3.bf16.msra.mxu0 %v795_v4  ;;  %26 = vst.msk [vmem:[#allocation2] sm:$0x1] %vm25_vm0, %v24_v12  ;;  %v804_v14 = vpack.c.bf16 %v111_v11, %v110_v10  ;;  %v29_v15 = vld [vmem:[%s1068_s2] sm:$0xff]  ;;  %v442_v42 = vld [vmem:[%s1066_s3 + $0x88] sm:$0xff]  ;;  %v443_v43 = vld [vmem:[%s1066_s3 + $0x90] sm:$0xff]  ;;  %s863_s2 = smov 32  }
   0x5   :  { %802 = vmatpush3.bf16.msra.mxu1 %v801_v9  ;;  %797 = vmatprep.subr.bf16.mxu0 %v860_v0  ;;  %v114_v19 = vsub.s32 0, %v948_v18  ;;  %v670_v25 = vld [vmem:[%s1069_s4] ss:$0 sm:$0xff]  ;;  %v196_v29 = vld [vmem:[%s1069_s4 + $0x1] sm:$0x1]  ;;  %v444_v45 = vld [vmem:[%s1066_s3 + $0x98] sm:$0xff] }
   0x6   :  { %803 = vmatprep.subr.bf16.mxu1 %v860_v0  ;;  %v441_v41 = vld [vmem:[%s1066_s3 + $0x80] sm:$0xff]  ;;  %v359_v47 = vld [vmem:[%s1066_s3 + $0x48] sm:$0xff]  ;;  %v360_v49 = vld [vmem:[%s1066_s3 + $0x50] sm:$0xff]  ;;  %v822_v51 = vpack.c.bf16 %v444_v45, %v443_v43  ;;  %vm657_vm7 = vcmask 130048   ;;  %vm659_vm8 = vcmask 392192   ;;  %vm661_vm9 = vcmask 457728  }
   0x7   :  { %v819_v44 = vpack.c.bf16 %v442_v42, %v441_v41  ;;  %v358_v46 = vld [vmem:[%s1066_s3 + $0x40] sm:$0xff]  ;;  %v361_v50 = vld [vmem:[%s1066_s3 + $0x58] sm:$0xff]  ;;  %v363_v54 = vld [vmem:[%s1066_s3 + $0x68] sm:$0xff] }
   0x8   :  { %799 = vmatpush3.bf16.msra.mxu0 %v798_v13  ;;  %v807_v48 = vpack.c.bf16 %v359_v47, %v358_v46  ;;  %v810_v52 = vpack.c.bf16 %v361_v50, %v360_v49  ;;  %v362_v53 = vld [vmem:[%s1066_s3 + $0x60] sm:$0xff]  ;;  %v364_v56 = vld [vmem:[%s1066_s3 + $0x70] sm:$0xff]  ;;  %v365_v57 = vld [vmem:[%s1066_s3 + $0x78] sm:$0xff] }
   0x9   :  { %805 = vmatpush3.bf16.msra.mxu1 %v804_v14  ;;  %735 = vmatprep.subr.mxu0 %v862_v8  ;;  %v813_v55 = vpack.c.bf16 %v363_v54, %v362_v53  ;;  %v816_v58 = vpack.c.bf16 %v365_v57, %v364_v56  ;;  %v445_v61 = vld [vmem:[%s1069_s4 + $0x3] sm:$0x1]  ;;  %v27_v2 = vld [vmem:[%s1070_s0] sm:$0x1]  ;;  %v366_v5 = vld [vmem:[%s1069_s4 + $0x2] sm:$0x1] }
   0xa   :  { %818 = vmatprep.subr.bf16.mxu1 %v860_v0  ;;  %v564_v41 = vld [vmem:[%s1069_s4 + $0x4] sm:$0x1] }
   0xb   :  { %v939_v16 = vld [vmem:[#allocation2] sm:$0x1] }
   0xc   :  { %722 = vmatmul.mubr.msk.f32.vlgmr.msra.gmra.mrb[0].mxu0 %vm34_vm2, %v939_v16  ;;  %733 = vmatmul.mubr.msk.f32.vlgmr.msra.gmra.mrb[0].mxu1 %vm34_vm2, %v29_v15 }
   0xd   :  { %737 = vmatprep.mubr.msk.f32.mxu0 %vm861_vm1, %v862_v8  ;;  %772 = vmatprep.mubr.msk.f32.mxu1 %vm861_vm1, %v862_v8 }
   0xe   :  { %820 = vmatpush3.bf16.msra.mxu1 %v819_v44 }
   0xf   :  { %821 = vmatprep.subr.bf16.mxu1 %v860_v0 }
  0x12   :  { %823 = vmatpush3.bf16.msra.mxu1 %v822_v51 }
  0x13   :  { %824 = vmatprep.subr.bf16.mxu1 %v860_v0 }
  0x15   :  { %773 = vmatmul.mubr.msk.f32.vlgmr.msra.gmra.mrb[2].mxu1 %vm34_vm2, %v939_v16 }
  0x16   :  { %791 = vmatprep.mubr.msk.f32.mxu1 %vm861_vm1, %v862_v8 }
  0xdf   :  { %v104_v20 = vpop.f32.mrb[0].mxu0  ;;  %v185_v21 = vpop.f32.mrb[0].mxu1 }
  0xe0   :  { %v115_v22 = vrot.slane %v104_v20, %v114_v19  ;;  %v723_v23 = vpop.f32.mrb[1].mxu0  ;;  %v734_v24 = vpop.f32.mrb[1].mxu1 }
  0xe1   :  { %v558_v23 = vld [vmem:[%s1066_s3 + $0xb0] sm:$0xff] }
  0xe2   :  { %v186_v26 = vadd.f32 %v185_v21, %v115_v22  ;;  %v556_v21 = vld [vmem:[%s1066_s3 + $0xa0] sm:$0xff]  ;;  %v557_v22 = vld [vmem:[%s1066_s3 + $0xa8] sm:$0xff] }
  0xe3   :  { %v825_v24 = vpack.c.bf16 %v557_v22, %v556_v21 }
  0xe4   :  { %v194_v27 = vadd.f32 %v670_v25, %v186_v26  ;;  %v559_v25 = vld [vmem:[%s1066_s3 + $0xb8] sm:$0xff] }
  0xe5   :  { %826 = vmatpush3.bf16.msra.mxu1 %v825_v24  ;;  %v828_v26 = vpack.c.bf16 %v559_v25, %v558_v23 }
  0xe6   :  { %844 = vtanh.f32 %v194_v27  ;;  %827 = vmatprep.subr.bf16.mxu1 %v860_v0 }
  0xe8   :  { %v512_v62 = vpop.f32.mrb[2].mxu1 }
  0xe9   :  { %v513_v63 = vadd.f32 %v512_v62, %v445_v61  ;;  %v774_v1 = vpop.f32.mrb[3].mxu1  ;;  %829 = vmatpush3.bf16.msra.mxu1 %v828_v26 }
  0xea   :  { %830 = vmatprep.subr.bf16.mxu1 %v860_v0 }
  0xf0   :  { %v845_v28 = vpop.eup %844 }
  0xf1   :  { %736 = vmatpush3.xpose.msra.mxu0 %v845_v28  ;;  %v560_v28 = vld [vmem:[%s1066_s3 + $0xc0] sm:$0xff] }
  0xf2   :  { %740 = vmatprep.subr.mxu0 %v862_v8 }
  0xf4   :  { %738 = vmatmul.mubr.f32.vlgmr.msra.gmra.mrb[2].mxu0 %v196_v29  ;;  %v561_v29 = vld [vmem:[%s1066_s3 + $0xc8] sm:$0xff] }
  0xf5   :  { %741 = vmatpush3.msra.mxu0 %v29_v15  ;;  %742 = vmatprep.mubr.msk.f32.mxu0 %vm861_vm1, %v862_v8 }
  0xf6   :  { %806 = vmatprep.subr.bf16.mxu0 %v860_v0 }
 0x1c7   :  { %v263_v30 = vpop.f32.mrb[2].mxu0 }
 0x1c8   :  { %v739_v31 = vpop.f32.mrb[3].mxu0  ;;  %v268_v32 = vsel %vm267_vm3, %v263_v30, -inf }
 0x1c9   :  { %269 = vmax.xlane.f32.xlu0 %v268_v32  ;;  %v831_v31 = vpack.c.bf16 %v561_v29, %v560_v28  ;;  %v562_v32 = vld [vmem:[%s1066_s3 + $0xd0] sm:$0xff] }
 0x1cb   :  { %832 = vmatpush3.bf16.msra.mxu1 %v831_v31 }
 0x1cc   :  { %833 = vmatprep.subr.bf16.mxu1 %v860_v0 }
 0x256   :  { %v270_v33 = vpop.xlane.xlu0 %269 }
 0x257   :  { %v271_v34 = vsub.f32 %v263_v30, %v270_v33  ;;  %v543_v30 = vrot.slane %v939_v16, %v114_v19  ;;  %v563_v33 = vld [vmem:[%s1066_s3 + $0xd8] sm:$0xff] }
 0x259   :  { %v272_v35 = vmul.f32 1.442695, %v271_v34  ;;  %v834_v34 = vpack.c.bf16 %v563_v33, %v562_v32 }
 0x25b   :  { %846 = vpow2.f32 %v272_v35  ;;  %835 = vmatpush3.bf16.msra.mxu1 %v834_v34 }
 0x265   :  { %v847_v36 = vpop.eup %846 }
 0x266   :  { %v274_v37 = vsel %vm267_vm3, %v847_v36, 0.0 }
 0x267   :  { %275 = vadd.xlane.f32.xlu0 %v274_v37 }
 0x2f4   :  { %v276_v38 = vpop.xlane.xlu0 %275 }
 0x2f5   :  { %848 = vrcp.f32 %v276_v38 }
 0x2ff   :  { %v849_v39 = vpop.eup %848 }
 0x300   :  { %v963_v40 = vmul.f32 %v849_v39, %v847_v36 }
 0x302   :  { %743 = vmatmul.mubr.msk.f32.vlgmr.msra.gmra.mrb[4].mxu0 %vm279_vm4, %v963_v40 }
 0x303   :  { %761 = vmatprep.mubr.msk.f32.mxu0 %vm861_vm1, %v862_v8  ;;  %808 = vmatpush3.bf16.msra.mxu0 %v807_v48 }
 0x304   :  { %809 = vmatprep.subr.bf16.mxu0 %v860_v0 }
 0x307   :  { %811 = vmatpush3.bf16.msra.mxu0 %v810_v52 }
 0x308   :  { %812 = vmatprep.subr.bf16.mxu0 %v860_v0 }
 0x30b   :  { %814 = vmatpush3.bf16.msra.mxu0 %v813_v55 }
 0x30c   :  { %815 = vmatprep.subr.bf16.mxu0 %v860_v0 }
 0x30f   :  { %817 = vmatpush3.bf16.msra.mxu0 %v816_v58 }
 0x3d5   :  { %v349_v59 = vpop.f32.mrb[4].mxu0 }
 0x3d6   :  { %354 = vrot.lane.b32.xlu1 %v349_v59, %s863_s2  ;;  %v744_v60 = vpop.f32.mrb[5].mxu0 }
 0x3da   :  { %524 = vrot.lane.b32.xlu1 %v513_v63, %s864_s15 }
 0x448   :  { %v355_v3 = vpop.permute.xlu1 %354 }
 0x449   :  { %v357_v4 = vsel %vm34_vm2, %v27_v2, %v355_v3 }
 0x44a   :  { %762 = vmatmul.mubr.msk.f32.vlgmr.msra.gmra.mrb[6].mxu0 %vm367_vm5, %v357_v4 }
 0x44c   :  { %v525_v13 = vpop.permute.xlu1 %524 }
 0x51d   :  { %v437_v6 = vpop.f32.mrb[6].mxu0 }
 0x51e   :  { %v438_v7 = vadd.f32 %v437_v6, %v366_v5  ;;  %v763_v8 = vpop.f32.mrb[7].mxu0 }
 0x520   :  { %v516_v9 = vadd.f32 %v513_v63, %v438_v7 }
 0x522   :  { %v674_v10 = vmul.f32 -1.442695, %v516_v9 }
 0x524   :  { %850 = vpow2.f32 %v674_v10 }
 0x52e   :  { %v851_v11 = vpop.eup %850 }
 0x52f   :  { %v520_v12 = vadd.f32 1.0, %v851_v11 }
 0x531   :  { %852 = vrcp.f32 %v520_v12 }
 0x53b   :  { %v853_v14 = vpop.eup %852 }
 0x53c   :  { %v527_v15 = vmul.f32 %v853_v14, %v525_v13  ;;  %v534_v18 = vsub.f32 1.0, %v853_v14 }
 0x53e   :  { %529 = vrot.lane.b32.xlu0 %v527_v15, %s864_s15 }
 0x5b0   :  { %v530_v17 = vpop.permute.xlu0 %529 }
 0x5b1   :  { %v532_v20 = vadd.f32 %v530_v17, %v438_v7 }
 0x5b3   :  { %854 = vtanh.f32 %v532_v20 }
 0x5bd   :  { %v855_v27 = vpop.eup %854 }
 0x5be   :  { %536 = vrot.lane.b32.xlu1 %v855_v27, %s865_s6 }
 0x5c2   :  { %544 = vrot.lane.b32.xlu1 %v543_v30, %s863_s2 }
 0x630   :  { %v537_v16 = vpop.permute.xlu1 %536 }
 0x631   :  { %v539_v35 = vmul.f32 %v537_v16, %v534_v18 }
 0x634   :  { %v545_v19 = vpop.permute.xlu1 %544 }
 0x635   :  { %v547_v36 = vmul.f32 %v853_v14, %v545_v19 }
 0x637   :  { %v548_v37 = vadd.f32 %v547_v36, %v539_v35 }
 0x639   :  { %550 = vrot.lane.b32.xlu1 %v548_v37, %s865_s6 }
 0x6ab   :  { %v551_v38 = vpop.permute.xlu1 %550 }
 0x6ac   :  { %554 = vst.msk [vmem:[#allocation2] sm:$0x1] %vm25_vm0, %v551_v38  ;;  %v555_v39 = vsel %vm34_vm2, %v551_v38, %v355_v3 }
 0x6ad   :  { %792 = vmatmul.mubr.msk.f32.vlgmr.msra.gmra.mrb[4].mxu1 %vm367_vm5, %v555_v39 }
 0x780   :  { %v634_v0 = vpop.f32.mrb[4].mxu1 }
 0x781   :  { %v635_v42 = vadd.f32 %v634_v0, %v564_v41  ;;  %v793_v43 = vpop.f32.mrb[5].mxu1 }
 0x783   :  { %v639_v44 = vsel %vm638_vm6, %v635_v42, -inf }
 0x784   :  { %640 = vmax.xlane.f32.xlu1 %v639_v44 }
 0x795   :  { %651 = vrot.lane.b32.xlu1 %v548_v37, %s866_s12 }
 0x811   :  { %v641_v45 = vpop.xlane.xlu1 %640 }
 0x812   :  { %v642_v46 = vsub.f32 %v635_v42, %v641_v45 }
 0x814   :  { %v643_v47 = vmul.f32 1.442695, %v642_v46 }
 0x815   :  { %v652_v54 = vpop.permute.xlu1 %651 }
 0x816   :  { %856 = vpow2.f32 %v643_v47 }
 0x820   :  { %v857_v48 = vpop.eup %856 }
 0x821   :  { %v645_v49 = vsel %vm638_vm6, %v857_v48, 0.0 }
 0x822   :  { %646 = vadd.xlane.f32.xlu0 %v645_v49 }
 0x838   :  { %654 = vrot.lane.b32.xlu0 %v963_v40, %s867_s1 }
 0x8af   :  { %v647_v50 = vpop.xlane.xlu0 %646 }
 0x8b0   :  { %858 = vlog2.f32 %v647_v50 }
 0x8b3   :  { %v655_v55 = vpop.permute.xlu0 %654 }
 0x8ba   :  { %v859_v51 = vpop.eup %858 }
 0x8bb   :  { %v649_v52 = vmul.f32 0.6931472, %v859_v51 }
 0x8bd   :  { %v650_v53 = vsub.f32 %v642_v46, %v649_v52 }
 0x8bf   :  { %v658_v56 = vsel %vm657_vm7, %v650_v53, %v652_v54 }
 0x8c0   :  { %v660_v57 = vsel %vm659_vm8, %v658_v56, %v655_v55 }
 0x8c1   :  { %v662_v58 = vsel %vm661_vm9, %v660_v57, 0.0 }
 0x8c2   :  { %663 = vst [vmem:[%s1071_s5] sm:$0x1] %v662_v58 }

</bundles_post_ra>
